<compile_context>
chip_gen: v7x
topology: tpu7x:2x2x1
jax: 0.10.0
libtpu: 0.0.40
codegen_flags: <defaults>
</compile_context>

<pallas_src>
import math

import jax
import jax.numpy as jnp
from jax.experimental import pallas as pl
from jax.experimental.pallas import tpu as pltpu

# ---- small synthetic shapes consistent with the module's forward ------------
B, S, H = 2, 8, 32          # batch, sequence, hidden
NH, DH = 2, 16              # heads, head dim (NH * DH == H)
FF = 64                     # FFN intermediate
DROPOUT_P = 0.3
LN_EPS = 1e-12
# keep iff uint32 random bits < (1 - p) * 2^32   (exact integer threshold)
KEEP_THRESHOLD = int((1.0 - DROPOUT_P) * 4294967296.0)

# TODO(synk): the real `transformer_model` is an arbitrary pretrained HF model
# passed to __init__; it is replaced here by a single deterministic encoder
# layer (same output contract: last_hidden_state of shape (B, S, H)).
# TODO(synk): dropout uses training-mode semantics (keep w.p. 0.7, scale 1/0.7);
# under model.eval() PyTorch's nn.Dropout is the identity.


def _layernorm(x, g, b, eps=LN_EPS):
    mu = jnp.mean(x, axis=-1, keepdims=True)
    d = x - mu
    var = jnp.mean(d * d, axis=-1, keepdims=True)
    return d * jax.lax.rsqrt(var + eps) * g + b


def fused_forward_kernel(x_ref, mask_ref, rnd_ref,
                         wqkv_ref, bqkv_ref, wo_ref, bo_ref,
                         g1_ref, be1_ref, w1_ref, bf1_ref, w2_ref, bf2_ref,
                         g2_ref, be2_ref, out_ref):
    """Encoder layer + CLS pooling + dropout for the whole batch, one step."""
    xf = x_ref[...].reshape(B * S, H)                               # (B*S, H)

    # --- fused QKV projection (all rows at once) ---
    qkv = jnp.dot(xf, wqkv_ref[...],
                  preferred_element_type=jnp.float32) + bqkv_ref[...]
    q = qkv[:, 0:H]
    k = qkv[:, H:2 * H]
    v = qkv[:, 2 * H:3 * H]

    # head-major stacking: (B*S, H) -> (NH*B, S, DH), leading-axis concat only
    def split_heads(t):
        t3 = t.reshape(B, S, H)
        return jnp.concatenate(
            [t3[:, :, h * DH:(h + 1) * DH] for h in range(NH)], axis=0)

    qh, kh, vh = split_heads(q), split_heads(k), split_heads(v)

    # --- attention: single batched contraction over B*NH, single softmax ---
    scale = 1.0 / math.sqrt(DH)
    s = jnp.einsum('bqd,bkd->bqk', qh, kh,
                   preferred_element_type=jnp.float32) * scale      # (NH*B,S,S)

    # additive attention mask (1.0 = attend, 0.0 = pad), broadcast over queries
    bias = (mask_ref[...] - 1.0) * 1e9                              # (B, S)
    bias = jnp.concatenate([bias.reshape(B, 1, S)] * NH, axis=0)    # (NH*B,1,S)
    s = s + bias

    s = s - jnp.max(s, axis=-1, keepdims=True)
    p = jnp.exp(s)
    p = p / jnp.sum(p, axis=-1, keepdims=True)
    o = jnp.einsum('bqk,bkd->bqd', p, vh,
                   preferred_element_type=jnp.float32)              # (NH*B,S,DH)

    # merge heads back: (NH*B, S, DH) -> (B*S, H)
    attn = jnp.concatenate([o[h * B:(h + 1) * B] for h in range(NH)],
                           axis=-1).reshape(B * S, H)
    attn = jnp.dot(attn, wo_ref[...],
                   preferred_element_type=jnp.float32) + bo_ref[...]

    h1 = _layernorm(xf + attn, g1_ref[...], be1_ref[...])

    # --- feed-forward ---
    f = jnp.dot(h1, w1_ref[...],
                preferred_element_type=jnp.float32) + bf1_ref[...]
    f = jax.nn.gelu(f, approximate=True)
    f = jnp.dot(f, w2_ref[...],
                preferred_element_type=jnp.float32) + bf2_ref[...]

    h2 = _layernorm(h1 + f, g2_ref[...], be2_ref[...])              # last_hidden_state

    # --- CLS pooling + dropout (training mode), fused epilogue ---
    cls = h2.reshape(B, S, H)[:, 0, :]                              # (B, H)
    keep = rnd_ref[...] < jnp.uint32(KEEP_THRESHOLD)                # int compare
    out_ref[...] = jnp.where(keep, cls * (1.0 / (1.0 - DROPOUT_P)), 0.0)


def base_model_forward(x, attention_mask, params, dropout_key):
    # Dropout randomness drawn host-side (TPU hardware PRNG has no interpret
    # lowering); applied inside the fused kernel with an integer threshold.
    rnd = jax.random.bits(dropout_key, (B, H), dtype=jnp.uint32)

    full = lambda shape: pl.BlockSpec(shape, lambda i, s=shape: (0,) * len(s))
    in_specs = [
        full((B, S, H)),                                # x (inputs_embeds)
        full((B, S)),                                   # attention_mask
        full((B, H)),                                   # dropout random bits
        full((H, 3 * H)), full((1, 3 * H)),             # Wqkv, bqkv
        full((H, H)),     full((1, H)),                 # Wo,   bo
        full((1, H)),     full((1, H)),                 # LN1 gamma, beta
        full((H, FF)),    full((1, FF)),                # W1, b1
        full((FF, H)),    full((1, H)),                 # W2, b2
        full((1, H)),     full((1, H)),                 # LN2 gamma, beta
    ]
    return pl.pallas_call(
        fused_forward_kernel,
        out_shape=jax.ShapeDtypeStruct((B, H), jnp.float32),
        grid=(1,),                                      # whole problem in one step
        in_specs=in_specs,
        out_specs=pl.BlockSpec((B, H), lambda i: (0, 0)),
        compiler_params=pltpu.CompilerParams(
            dimension_semantics=("arbitrary",),
            vmem_limit_bytes=16 * 1024 * 1024),
    )(x, attention_mask, rnd, *params)


def init_params(key):
    ks = jax.random.split(key, 4)
    std = 0.02
    wqkv = jax.random.normal(ks[0], (H, 3 * H), jnp.float32) * std
    bqkv = jnp.zeros((1, 3 * H), jnp.float32)
    wo = jax.random.normal(ks[1], (H, H), jnp.float32) * std
    bo = jnp.zeros((1, H), jnp.float32)
    g1 = jnp.ones((1, H), jnp.float32)
    be1 = jnp.zeros((1, H), jnp.float32)
    w1 = jax.random.normal(ks[2], (H, FF), jnp.float32) * std
    bf1 = jnp.zeros((1, FF), jnp.float32)
    w2 = jax.random.normal(ks[3], (FF, H), jnp.float32) * std
    bf2 = jnp.zeros((1, H), jnp.float32)
    g2 = jnp.ones((1, H), jnp.float32)
    be2 = jnp.zeros((1, H), jnp.float32)
    return (wqkv, bqkv, wo, bo, g1, be1, w1, bf1, w2, bf2, g2, be2)


if __name__ == "__main__":
    key = jax.random.PRNGKey(0)
    k_x, k_p, k_d = jax.random.split(key, 3)
    # `inputs` to the HF model would be {input_ids, attention_mask}; the
    # synthetic encoder takes the embedded hidden states + attention_mask.
    x = jax.random.normal(k_x, (B, S, H), jnp.float32)
    attention_mask = jnp.ones((B, S), jnp.float32)
    params = init_params(k_p)

    out = base_model_forward(x, attention_mask, params, k_d)
    out = jax.block_until_ready(out)
    assert out.shape == (B, H) and out.dtype == jnp.float32
    assert bool(jnp.all(jnp.isfinite(out)))
    print("KERNEL_OK")
</pallas_src>

<mosaic_0001>
module attributes {stable_mosaic.version = 11 : i64} {
  func.func @fused_forward_kernel(%arg0: i32, %arg1: memref<2x8x32xf32, #tpu.memory_space<vmem>>, %arg2: memref<2x8xf32, #tpu.memory_space<vmem>>, %arg3: memref<2x32xi32, #tpu.memory_space<vmem>>, %arg4: memref<32x96xf32, #tpu.memory_space<vmem>>, %arg5: memref<1x96xf32, #tpu.memory_space<vmem>>, %arg6: memref<32x32xf32, #tpu.memory_space<vmem>>, %arg7: memref<1x32xf32, #tpu.memory_space<vmem>>, %arg8: memref<1x32xf32, #tpu.memory_space<vmem>>, %arg9: memref<1x32xf32, #tpu.memory_space<vmem>>, %arg10: memref<32x64xf32, #tpu.memory_space<vmem>>, %arg11: memref<1x64xf32, #tpu.memory_space<vmem>>, %arg12: memref<64x32xf32, #tpu.memory_space<vmem>>, %arg13: memref<1x32xf32, #tpu.memory_space<vmem>>, %arg14: memref<1x32xf32, #tpu.memory_space<vmem>>, %arg15: memref<1x32xf32, #tpu.memory_space<vmem>>, %arg16: memref<2x32xf32, #tpu.memory_space<vmem>>) attributes {dimension_semantics = [#tpu.dimension_semantics<arbitrary>], iteration_bounds = array<i64: 1>, scalar_prefetch = 0 : i64, scratch_operands = 0 : i64, tpu.core_type = #tpu.core_type<tc>, window_params = [{pipeline_mode = #tpu.pipeline_mode<synchronous>, transform_indices = @transform_0, window_bounds = array<i64: 2, 8, 32>}, {pipeline_mode = #tpu.pipeline_mode<synchronous>, transform_indices = @transform_1, window_bounds = array<i64: 2, 8>}, {pipeline_mode = #tpu.pipeline_mode<synchronous>, transform_indices = @transform_2, window_bounds = array<i64: 2, 32>}, {pipeline_mode = #tpu.pipeline_mode<synchronous>, transform_indices = @transform_3, window_bounds = array<i64: 32, 96>}, {pipeline_mode = #tpu.pipeline_mode<synchronous>, transform_indices = @transform_4, window_bounds = array<i64: 1, 96>}, {pipeline_mode = #tpu.pipeline_mode<synchronous>, transform_indices = @transform_5, window_bounds = array<i64: 32, 32>}, {pipeline_mode = #tpu.pipeline_mode<synchronous>, transform_indices = @transform_6, window_bounds = array<i64: 1, 32>}, {pipeline_mode = #tpu.pipeline_mode<synchronous>, transform_indices = @transform_7, window_bounds = array<i64: 1, 32>}, {pipeline_mode = #tpu.pipeline_mode<synchronous>, transform_indices = @transform_8, window_bounds = array<i64: 1, 32>}, {pipeline_mode = #tpu.pipeline_mode<synchronous>, transform_indices = @transform_9, window_bounds = array<i64: 32, 64>}, {pipeline_mode = #tpu.pipeline_mode<synchronous>, transform_indices = @transform_10, window_bounds = array<i64: 1, 64>}, {pipeline_mode = #tpu.pipeline_mode<synchronous>, transform_indices = @transform_11, window_bounds = array<i64: 64, 32>}, {pipeline_mode = #tpu.pipeline_mode<synchronous>, transform_indices = @transform_12, window_bounds = array<i64: 1, 32>}, {pipeline_mode = #tpu.pipeline_mode<synchronous>, transform_indices = @transform_13, window_bounds = array<i64: 1, 32>}, {pipeline_mode = #tpu.pipeline_mode<synchronous>, transform_indices = @transform_14, window_bounds = array<i64: 1, 32>}, {pipeline_mode = #tpu.pipeline_mode<synchronous>, transform_indices = @transform_15, window_bounds = array<i64: 2, 32>}]} {
    %c0 = arith.constant 0 : index
    %c0_0 = arith.constant 0 : index
    %c0_1 = arith.constant 0 : index
    %0 = vector.load %arg1[%c0, %c0_0, %c0_1] : memref<2x8x32xf32, #tpu.memory_space<vmem>>, vector<2x8x32xf32>
    %1 = vector.shape_cast %0 : vector<2x8x32xf32> to vector<16x32xf32>
    %c0_2 = arith.constant 0 : index
    %c0_3 = arith.constant 0 : index
    %2 = vector.load %arg4[%c0_2, %c0_3] : memref<32x96xf32, #tpu.memory_space<vmem>>, vector<32x96xf32>
    %cst = arith.constant dense<0.000000e+00> : vector<16x96xf32>
    %3 = tpu.matmul %1, %2, %cst {dimension_numbers = #tpu.dot_dimension_numbers<[1], [0], [0], [1], [0, 0, 1, 1], [], []>} : vector<16x32xf32>, vector<32x96xf32>, vector<16x96xf32> -> vector<16x96xf32>
    %c0_4 = arith.constant 0 : index
    %c0_5 = arith.constant 0 : index
    %4 = vector.load %arg5[%c0_4, %c0_5] : memref<1x96xf32, #tpu.memory_space<vmem>>, vector<1x96xf32>
    %5 = vector.broadcast %4 : vector<1x96xf32> to vector<16x96xf32>
    %6 = arith.addf %3, %5 : vector<16x96xf32>
    %7 = vector.extract_strided_slice %6 {offsets = [0, 0], sizes = [16, 32], strides = [1, 1]} : vector<16x96xf32> to vector<16x32xf32>
    %8 = vector.extract_strided_slice %6 {offsets = [0, 32], sizes = [16, 32], strides = [1, 1]} : vector<16x96xf32> to vector<16x32xf32>
    %9 = vector.extract_strided_slice %6 {offsets = [0, 64], sizes = [16, 32], strides = [1, 1]} : vector<16x96xf32> to vector<16x32xf32>
    %10 = vector.shape_cast %7 : vector<16x32xf32> to vector<2x8x32xf32>
    %11 = vector.extract_strided_slice %10 {offsets = [0, 0, 0], sizes = [2, 8, 16], strides = [1, 1, 1]} : vector<2x8x32xf32> to vector<2x8x16xf32>
    %12 = vector.extract_strided_slice %10 {offsets = [0, 0, 16], sizes = [2, 8, 16], strides = [1, 1, 1]} : vector<2x8x32xf32> to vector<2x8x16xf32>
    %13 = tpu.concatenate %11, %12 in 0 : vector<2x8x16xf32>, vector<2x8x16xf32> -> vector<4x8x16xf32>
    %14 = vector.shape_cast %8 : vector<16x32xf32> to vector<2x8x32xf32>
    %15 = vector.extract_strided_slice %14 {offsets = [0, 0, 0], sizes = [2, 8, 16], strides = [1, 1, 1]} : vector<2x8x32xf32> to vector<2x8x16xf32>
    %16 = vector.extract_strided_slice %14 {offsets = [0, 0, 16], sizes = [2, 8, 16], strides = [1, 1, 1]} : vector<2x8x32xf32> to vector<2x8x16xf32>
    %17 = tpu.concatenate %15, %16 in 0 : vector<2x8x16xf32>, vector<2x8x16xf32> -> vector<4x8x16xf32>
    %18 = vector.shape_cast %9 : vector<16x32xf32> to vector<2x8x32xf32>
    %19 = vector.extract_strided_slice %18 {offsets = [0, 0, 0], sizes = [2, 8, 16], strides = [1, 1, 1]} : vector<2x8x32xf32> to vector<2x8x16xf32>
    %20 = vector.extract_strided_slice %18 {offsets = [0, 0, 16], sizes = [2, 8, 16], strides = [1, 1, 1]} : vector<2x8x32xf32> to vector<2x8x16xf32>
    %21 = tpu.concatenate %19, %20 in 0 : vector<2x8x16xf32>, vector<2x8x16xf32> -> vector<4x8x16xf32>
    "tpu.trace_start"() <{level = 10 : i32, message = "bqd,bkd->bqk"}> : () -> ()
    %cst_6 = arith.constant dense<0.000000e+00> : vector<4x8x8xf32>
    %22 = tpu.matmul %13, %17, %cst_6 {dimension_numbers = #tpu.dot_dimension_numbers<[2], [2], [1], [1], [0, 0, 0, 1, 1, 1], [0], [0]>} : vector<4x8x16xf32>, vector<4x8x16xf32>, vector<4x8x8xf32> -> vector<4x8x8xf32>
    "tpu.trace_stop"() : () -> ()
    %cst_7 = arith.constant 2.500000e-01 : f32
    %23 = vector.broadcast %cst_7 : f32 to vector<4x8x8xf32>
    %24 = arith.mulf %22, %23 : vector<4x8x8xf32>
    %c0_8 = arith.constant 0 : index
    %c0_9 = arith.constant 0 : index
    %25 = vector.load %arg2[%c0_8, %c0_9] : memref<2x8xf32, #tpu.memory_space<vmem>>, vector<2x8xf32>
    %cst_10 = arith.constant 1.000000e+00 : f32
    %26 = vector.broadcast %cst_10 : f32 to vector<2x8xf32>
    %27 = arith.subf %25, %26 : vector<2x8xf32>
    %cst_11 = arith.constant 1.000000e+09 : f32
    %28 = vector.broadcast %cst_11 : f32 to vector<2x8xf32>
    %29 = arith.mulf %27, %28 : vector<2x8xf32>
    %30 = vector.shape_cast %29 : vector<2x8xf32> to vector<2x1x8xf32>
    %31 = tpu.concatenate %30, %30 in 0 : vector<2x1x8xf32>, vector<2x1x8xf32> -> vector<4x1x8xf32>
    %32 = vector.broadcast %31 : vector<4x1x8xf32> to vector<4x8x8xf32>
    %33 = arith.addf %24, %32 : vector<4x8x8xf32>
    %cst_12 = arith.constant dense<0xFF800000> : vector<4x8xf32>
    %34 = vector.multi_reduction <maximumf>, %33, %cst_12 [2] : vector<4x8x8xf32> to vector<4x8xf32>
    %35 = vector.shape_cast %34 : vector<4x8xf32> to vector<4x8x1xf32>
    %36 = vector.broadcast %35 : vector<4x8x1xf32> to vector<4x8x8xf32>
    %37 = arith.subf %33, %36 : vector<4x8x8xf32>
    %38 = math.exp %37 : vector<4x8x8xf32>
    %cst_13 = arith.constant dense<0.000000e+00> : vector<4x8xf32>
    %39 = vector.multi_reduction <add>, %38, %cst_13 [2] : vector<4x8x8xf32> to vector<4x8xf32>
    %40 = vector.shape_cast %39 : vector<4x8xf32> to vector<4x8x1xf32>
    %41 = vector.broadcast %40 : vector<4x8x1xf32> to vector<4x8x8xf32>
    %42 = arith.divf %38, %41 : vector<4x8x8xf32>
    "tpu.trace_start"() <{level = 10 : i32, message = "bqk,bkd->bqd"}> : () -> ()
    %cst_14 = arith.constant dense<0.000000e+00> : vector<4x8x16xf32>
    %43 = tpu.matmul %42, %21, %cst_14 {dimension_numbers = #tpu.dot_dimension_numbers<[2], [1], [1], [2], [0, 0, 0, 1, 1, 2], [0], [0]>} : vector<4x8x8xf32>, vector<4x8x16xf32>, vector<4x8x16xf32> -> vector<4x8x16xf32>
    "tpu.trace_stop"() : () -> ()
    %44 = vector.extract_strided_slice %43 {offsets = [0, 0, 0], sizes = [2, 8, 16], strides = [1, 1, 1]} : vector<4x8x16xf32> to vector<2x8x16xf32>
    %45 = vector.extract_strided_slice %43 {offsets = [2, 0, 0], sizes = [2, 8, 16], strides = [1, 1, 1]} : vector<4x8x16xf32> to vector<2x8x16xf32>
    %46 = tpu.concatenate %44, %45 in 2 : vector<2x8x16xf32>, vector<2x8x16xf32> -> vector<2x8x32xf32>
    %47 = vector.shape_cast %46 : vector<2x8x32xf32> to vector<16x32xf32>
    %c0_15 = arith.constant 0 : index
    %c0_16 = arith.constant 0 : index
    %48 = vector.load %arg6[%c0_15, %c0_16] : memref<32x32xf32, #tpu.memory_space<vmem>>, vector<32x32xf32>
    %cst_17 = arith.constant dense<0.000000e+00> : vector<16x32xf32>
    %49 = tpu.matmul %47, %48, %cst_17 {dimension_numbers = #tpu.dot_dimension_numbers<[1], [0], [0], [1], [0, 0, 1, 1], [], []>} : vector<16x32xf32>, vector<32x32xf32>, vector<16x32xf32> -> vector<16x32xf32>
    %c0_18 = arith.constant 0 : index
    %c0_19 = arith.constant 0 : index
    %50 = vector.load %arg7[%c0_18, %c0_19] : memref<1x32xf32, #tpu.memory_space<vmem>>, vector<1x32xf32>
    %51 = vector.broadcast %50 : vector<1x32xf32> to vector<16x32xf32>
    %52 = arith.addf %49, %51 : vector<16x32xf32>
    %53 = arith.addf %1, %52 : vector<16x32xf32>
    %c0_20 = arith.constant 0 : index
    %c0_21 = arith.constant 0 : index
    %54 = vector.load %arg8[%c0_20, %c0_21] : memref<1x32xf32, #tpu.memory_space<vmem>>, vector<1x32xf32>
    %c0_22 = arith.constant 0 : index
    %c0_23 = arith.constant 0 : index
    %55 = vector.load %arg9[%c0_22, %c0_23] : memref<1x32xf32, #tpu.memory_space<vmem>>, vector<1x32xf32>
    %cst_24 = arith.constant dense<0.000000e+00> : vector<16xf32>
    %56 = vector.multi_reduction <add>, %53, %cst_24 [1] : vector<16x32xf32> to vector<16xf32>
    %57 = vector.shape_cast %56 : vector<16xf32> to vector<16x1xf32>
    %cst_25 = arith.constant 3.200000e+01 : f32
    %58 = vector.broadcast %cst_25 : f32 to vector<16x1xf32>
    %59 = arith.divf %57, %58 : vector<16x1xf32>
    %60 = vector.broadcast %59 : vector<16x1xf32> to vector<16x32xf32>
    %61 = arith.subf %53, %60 : vector<16x32xf32>
    %62 = arith.mulf %61, %61 : vector<16x32xf32>
    %cst_26 = arith.constant dense<0.000000e+00> : vector<16xf32>
    %63 = vector.multi_reduction <add>, %62, %cst_26 [1] : vector<16x32xf32> to vector<16xf32>
    %64 = vector.shape_cast %63 : vector<16xf32> to vector<16x1xf32>
    %cst_27 = arith.constant 3.200000e+01 : f32
    %65 = vector.broadcast %cst_27 : f32 to vector<16x1xf32>
    %66 = arith.divf %64, %65 : vector<16x1xf32>
    %cst_28 = arith.constant 9.99999996E-13 : f32
    %67 = vector.broadcast %cst_28 : f32 to vector<16x1xf32>
    %68 = arith.addf %66, %67 : vector<16x1xf32>
    %69 = math.rsqrt %68 : vector<16x1xf32>
    %70 = vector.broadcast %69 : vector<16x1xf32> to vector<16x32xf32>
    %71 = arith.mulf %61, %70 : vector<16x32xf32>
    %72 = vector.broadcast %54 : vector<1x32xf32> to vector<16x32xf32>
    %73 = arith.mulf %71, %72 : vector<16x32xf32>
    %74 = vector.broadcast %55 : vector<1x32xf32> to vector<16x32xf32>
    %75 = arith.addf %73, %74 : vector<16x32xf32>
    %c0_29 = arith.constant 0 : index
    %c0_30 = arith.constant 0 : index
    %76 = vector.load %arg10[%c0_29, %c0_30] : memref<32x64xf32, #tpu.memory_space<vmem>>, vector<32x64xf32>
    %cst_31 = arith.constant dense<0.000000e+00> : vector<16x64xf32>
    %77 = tpu.matmul %75, %76, %cst_31 {dimension_numbers = #tpu.dot_dimension_numbers<[1], [0], [0], [1], [0, 0, 1, 1], [], []>} : vector<16x32xf32>, vector<32x64xf32>, vector<16x64xf32> -> vector<16x64xf32>
    %c0_32 = arith.constant 0 : index
    %c0_33 = arith.constant 0 : index
    %78 = vector.load %arg11[%c0_32, %c0_33] : memref<1x64xf32, #tpu.memory_space<vmem>>, vector<1x64xf32>
    %79 = vector.broadcast %78 : vector<1x64xf32> to vector<16x64xf32>
    %80 = arith.addf %77, %79 : vector<16x64xf32>
    %81 = arith.mulf %80, %80 : vector<16x64xf32>
    %82 = arith.mulf %80, %81 : vector<16x64xf32>
    %cst_34 = arith.constant 4.471500e-02 : f32
    %83 = vector.broadcast %cst_34 : f32 to vector<16x64xf32>
    %84 = arith.mulf %83, %82 : vector<16x64xf32>
    %85 = arith.addf %80, %84 : vector<16x64xf32>
    %cst_35 = arith.constant 0.797884583 : f32
    %86 = vector.broadcast %cst_35 : f32 to vector<16x64xf32>
    %87 = arith.mulf %86, %85 : vector<16x64xf32>
    %88 = math.tanh %87 : vector<16x64xf32>
    %cst_36 = arith.constant 1.000000e+00 : f32
    %89 = vector.broadcast %cst_36 : f32 to vector<16x64xf32>
    %90 = arith.addf %89, %88 : vector<16x64xf32>
    %cst_37 = arith.constant 5.000000e-01 : f32
    %91 = vector.broadcast %cst_37 : f32 to vector<16x64xf32>
    %92 = arith.mulf %91, %90 : vector<16x64xf32>
    %93 = arith.mulf %80, %92 : vector<16x64xf32>
    %c0_38 = arith.constant 0 : index
    %c0_39 = arith.constant 0 : index
    %94 = vector.load %arg12[%c0_38, %c0_39] : memref<64x32xf32, #tpu.memory_space<vmem>>, vector<64x32xf32>
    %cst_40 = arith.constant dense<0.000000e+00> : vector<16x32xf32>
    %95 = tpu.matmul %93, %94, %cst_40 {dimension_numbers = #tpu.dot_dimension_numbers<[1], [0], [0], [1], [0, 0, 1, 1], [], []>} : vector<16x64xf32>, vector<64x32xf32>, vector<16x32xf32> -> vector<16x32xf32>
    %c0_41 = arith.constant 0 : index
    %c0_42 = arith.constant 0 : index
    %96 = vector.load %arg13[%c0_41, %c0_42] : memref<1x32xf32, #tpu.memory_space<vmem>>, vector<1x32xf32>
    %97 = vector.broadcast %96 : vector<1x32xf32> to vector<16x32xf32>
    %98 = arith.addf %95, %97 : vector<16x32xf32>
    %99 = arith.addf %75, %98 : vector<16x32xf32>
    %c0_43 = arith.constant 0 : index
    %c0_44 = arith.constant 0 : index
    %100 = vector.load %arg14[%c0_43, %c0_44] : memref<1x32xf32, #tpu.memory_space<vmem>>, vector<1x32xf32>
    %c0_45 = arith.constant 0 : index
    %c0_46 = arith.constant 0 : index
    %101 = vector.load %arg15[%c0_45, %c0_46] : memref<1x32xf32, #tpu.memory_space<vmem>>, vector<1x32xf32>
    %cst_47 = arith.constant dense<0.000000e+00> : vector<16xf32>
    %102 = vector.multi_reduction <add>, %99, %cst_47 [1] : vector<16x32xf32> to vector<16xf32>
    %103 = vector.shape_cast %102 : vector<16xf32> to vector<16x1xf32>
    %cst_48 = arith.constant 3.200000e+01 : f32
    %104 = vector.broadcast %cst_48 : f32 to vector<16x1xf32>
    %105 = arith.divf %103, %104 : vector<16x1xf32>
    %106 = vector.broadcast %105 : vector<16x1xf32> to vector<16x32xf32>
    %107 = arith.subf %99, %106 : vector<16x32xf32>
    %108 = arith.mulf %107, %107 : vector<16x32xf32>
    %cst_49 = arith.constant dense<0.000000e+00> : vector<16xf32>
    %109 = vector.multi_reduction <add>, %108, %cst_49 [1] : vector<16x32xf32> to vector<16xf32>
    %110 = vector.shape_cast %109 : vector<16xf32> to vector<16x1xf32>
    %cst_50 = arith.constant 3.200000e+01 : f32
    %111 = vector.broadcast %cst_50 : f32 to vector<16x1xf32>
    %112 = arith.divf %110, %111 : vector<16x1xf32>
    %cst_51 = arith.constant 9.99999996E-13 : f32
    %113 = vector.broadcast %cst_51 : f32 to vector<16x1xf32>
    %114 = arith.addf %112, %113 : vector<16x1xf32>
    %115 = math.rsqrt %114 : vector<16x1xf32>
    %116 = vector.broadcast %115 : vector<16x1xf32> to vector<16x32xf32>
    %117 = arith.mulf %107, %116 : vector<16x32xf32>
    %118 = vector.broadcast %100 : vector<1x32xf32> to vector<16x32xf32>
    %119 = arith.mulf %117, %118 : vector<16x32xf32>
    %120 = vector.broadcast %101 : vector<1x32xf32> to vector<16x32xf32>
    %121 = arith.addf %119, %120 : vector<16x32xf32>
    %122 = vector.shape_cast %121 : vector<16x32xf32> to vector<2x8x32xf32>
    %123 = vector.extract_strided_slice %122 {offsets = [0, 0, 0], sizes = [2, 1, 32], strides = [1, 1, 1]} : vector<2x8x32xf32> to vector<2x1x32xf32>
    %124 = vector.shape_cast %123 : vector<2x1x32xf32> to vector<2x32xf32>
    %c0_52 = arith.constant 0 : index
    %c0_53 = arith.constant 0 : index
    %125 = vector.load %arg3[%c0_52, %c0_53] : memref<2x32xi32, #tpu.memory_space<vmem>>, vector<2x32xi32>
    %c-1288490189_i32 = arith.constant -1288490189 : i32
    %126 = vector.broadcast %c-1288490189_i32 : i32 to vector<2x32xi32>
    %127 = arith.cmpi ult, %125, %126 : vector<2x32xi32>
    %cst_54 = arith.constant 1.42857146 : f32
    %128 = vector.broadcast %cst_54 : f32 to vector<2x32xf32>
    %129 = arith.mulf %124, %128 : vector<2x32xf32>
    %cst_55 = arith.constant 0.000000e+00 : f32
    %130 = vector.broadcast %cst_55 : f32 to vector<2x32xf32>
    %131 = arith.select %127, %129, %130 : vector<2x32xi1>, vector<2x32xf32>
    %c0_56 = arith.constant 0 : index
    %c0_57 = arith.constant 0 : index
    %132 = vector.load %arg16[%c0_56, %c0_57] : memref<2x32xf32, #tpu.memory_space<vmem>>, vector<2x32xf32>
    tpu.vector_store %arg16[%c0_56, %c0_57], %131 {strides = array<i32>} : memref<2x32xf32, #tpu.memory_space<vmem>>, vector<2x32xf32>,
    return
  }
  func.func @transform_0(%arg0: i32) -> (i32, i32, i32) {
    %c0_i32 = arith.constant 0 : i32
    %c0_i32_0 = arith.constant 0 : i32
    %c0_i32_1 = arith.constant 0 : i32
    %c0_i32_2 = arith.constant 0 : i32
    return %c0_i32, %c0_i32_0, %c0_i32_1 : i32, i32, i32
  }
  func.func @transform_1(%arg0: i32) -> (i32, i32) {
    %c0_i32 = arith.constant 0 : i32
    %c0_i32_0 = arith.constant 0 : i32
    %c0_i32_1 = arith.constant 0 : i32
    return %c0_i32, %c0_i32_0 : i32, i32
  }
  func.func @transform_2(%arg0: i32) -> (i32, i32) {
    %c0_i32 = arith.constant 0 : i32
    %c0_i32_0 = arith.constant 0 : i32
    %c0_i32_1 = arith.constant 0 : i32
    return %c0_i32, %c0_i32_0 : i32, i32
  }
  func.func @transform_3(%arg0: i32) -> (i32, i32) {
    %c0_i32 = arith.constant 0 : i32
    %c0_i32_0 = arith.constant 0 : i32
    %c0_i32_1 = arith.constant 0 : i32
    return %c0_i32, %c0_i32_0 : i32, i32
  }
  func.func @transform_4(%arg0: i32) -> (i32, i32) {
    %c0_i32 = arith.constant 0 : i32
    %c0_i32_0 = arith.constant 0 : i32
    %c0_i32_1 = arith.constant 0 : i32
    return %c0_i32, %c0_i32_0 : i32, i32
  }
  func.func @transform_5(%arg0: i32) -> (i32, i32) {
    %c0_i32 = arith.constant 0 : i32
    %c0_i32_0 = arith.constant 0 : i32
    %c0_i32_1 = arith.constant 0 : i32
    return %c0_i32, %c0_i32_0 : i32, i32
  }
  func.func @transform_6(%arg0: i32) -> (i32, i32) {
    %c0_i32 = arith.constant 0 : i32
    %c0_i32_0 = arith.constant 0 : i32
    %c0_i32_1 = arith.constant 0 : i32
    return %c0_i32, %c0_i32_0 : i32, i32
  }
  func.func @transform_7(%arg0: i32) -> (i32, i32) {
    %c0_i32 = arith.constant 0 : i32
    %c0_i32_0 = arith.constant 0 : i32
    %c0_i32_1 = arith.constant 0 : i32
    return %c0_i32, %c0_i32_0 : i32, i32
  }
  func.func @transform_8(%arg0: i32) -> (i32, i32) {
    %c0_i32 = arith.constant 0 : i32
    %c0_i32_0 = arith.constant 0 : i32
    %c0_i32_1 = arith.constant 0 : i32
    return %c0_i32, %c0_i32_0 : i32, i32
  }
  func.func @transform_9(%arg0: i32) -> (i32, i32) {
    %c0_i32 = arith.constant 0 : i32
    %c0_i32_0 = arith.constant 0 : i32
    %c0_i32_1 = arith.constant 0 : i32
    return %c0_i32, %c0_i32_0 : i32, i32
  }
  func.func @transform_10(%arg0: i32) -> (i32, i32) {
    %c0_i32 = arith.constant 0 : i32
    %c0_i32_0 = arith.constant 0 : i32
    %c0_i32_1 = arith.constant 0 : i32
    return %c0_i32, %c0_i32_0 : i32, i32
  }
  func.func @transform_11(%arg0: i32) -> (i32, i32) {
    %c0_i32 = arith.constant 0 : i32
    %c0_i32_0 = arith.constant 0 : i32
    %c0_i32_1 = arith.constant 0 : i32
    return %c0_i32, %c0_i32_0 : i32, i32
  }
  func.func @transform_12(%arg0: i32) -> (i32, i32) {
    %c0_i32 = arith.constant 0 : i32
    %c0_i32_0 = arith.constant 0 : i32
    %c0_i32_1 = arith.constant 0 : i32
    return %c0_i32, %c0_i32_0 : i32, i32
  }
  func.func @transform_13(%arg0: i32) -> (i32, i32) {
    %c0_i32 = arith.constant 0 : i32
    %c0_i32_0 = arith.constant 0 : i32
    %c0_i32_1 = arith.constant 0 : i32
    return %c0_i32, %c0_i32_0 : i32, i32
  }
  func.func @transform_14(%arg0: i32) -> (i32, i32) {
    %c0_i32 = arith.constant 0 : i32
    %c0_i32_0 = arith.constant 0 : i32
    %c0_i32_1 = arith.constant 0 : i32
    return %c0_i32, %c0_i32_0 : i32, i32
  }
  func.func @transform_15(%arg0: i32) -> (i32, i32) {
    %c0_i32 = arith.constant 0 : i32
    %c0_i32_0 = arith.constant 0 : i32
    %c0_i32_1 = arith.constant 0 : i32
    return %c0_i32, %c0_i32_0 : i32, i32
  }
}

</mosaic_0001>

<bundles_post_ra>
// kernel: tpu_custom_call.1
= control target key start
LH: loop header
LB: loop body
LE: loop exit
PB: predicated region body
PF: predicated region fallthrough
CT: control target
= control target key end

     0   :  { %20 = vsyncpa [#allocation3], 0  ;;  %s1879_s0 = inlined_call_operand.hbm [shape: f32[2,8,32], index: 0, kind: input, shape index: {}]   ;;  %s1880_s1 = inlined_call_operand.vmem [shape: f32[2,8], index: 1, kind: input, shape index: {}]   ;;  %s1881_s2 = inlined_call_operand.vmem [shape: u32[2,32], index: 2, kind: input, shape index: {}]   ;;  %s1882_s3 = inlined_call_operand.vmem [shape: f32[32,96], index: 3, kind: input, shape index: {}]   ;;  %s1883_s4 = inlined_call_operand.vmem [shape: f32[1,96], index: 4, kind: input, shape index: {}]   ;;  %s1884_s5 = inlined_call_operand.vmem [shape: f32[32,32], index: 5, kind: input, shape index: {}]   ;;  %s1885_s6 = inlined_call_operand.vmem [shape: f32[1,32], index: 6, kind: input, shape index: {}]   ;;  %s1886_s7 = inlined_call_operand.vmem [shape: f32[1,32], index: 7, kind: input, shape index: {}]   ;;  %s1887_s8 = inlined_call_operand.vmem [shape: f32[1,32], index: 8, kind: input, shape index: {}]   ;;  %s1888_s9 = inlined_call_operand.vmem [shape: f32[32,64], index: 9, kind: input, shape index: {}]   ;;  %s1889_s10 = inlined_call_operand.vmem [shape: f32[1,64], index: 10, kind: input, shape index: {}]   ;;  %s1890_s11 = inlined_call_operand.vmem [shape: f32[64,32], index: 11, kind: input, shape index: {}]   ;;  %s1891_s12 = inlined_call_operand.vmem [shape: f32[1,32], index: 12, kind: input, shape index: {}]   ;;  %s1892_s13 = inlined_call_operand.vmem [shape: f32[1,32], index: 13, kind: input, shape index: {}]   ;;  %s1893_s14 = inlined_call_operand.vmem [shape: f32[1,32], index: 14, kind: input, shape index: {}]   ;;  %s1894_s15 = inlined_call_operand.hbm [shape: f32[2,32], index: 15, kind: output, shape index: {}]  }
   0x1   :  { %21 = vsyncpa [#allocation4], 0  ;;  %s1586_s18 = smov [#allocation2]   ;;  %s1538_s22 = scalar_lea.hbm %s1879_s0, 256 }
   0x2   :  { %s27_s19 = sshll.u32 %s1586_s18, 4  ;;  %p1539_p0 = scmp.ne.s32.totalorder %s1879_s0, %s1538_s22  ;;  %s28_s19 = int_to_ptr.vmem [resolvable:$true] %s27_s19 }
   0x3   :  { %p1542_p1 = scmp.lt.u32.totalorder %s1538_s22, %s1879_s0 }
   0x5   :  { %p1544_p2 = pnand %p1542_p1, %p1539_p0 }
   0x7   :  { %1547 = shalt.err (!%p1544_p2)
}
   0x8   :  { %s1548_s27 = scalar_lea.vmem %s28_s19, 256  ;;  %p1553_p4 = scmp.lt.s32.totalorder %s28_s19, %s28_s19 }
   0x9   :  { %p1549_p3 = scmp.ne.s32.totalorder %s28_s19, %s1548_s27  ;;  %p1554_p5 = scmp.lt.s32.totalorder %s1548_s27, %s1548_s27 }
   0xb   :  { %p1555_p6 = por %p1554_p5, %p1553_p4 }
   0xd   :  { %p1556_p7 = pnand %p1555_p6, %p1549_p3 }
   0xf   :  { %1559 = shalt.err (!%p1556_p7)
}
  0x10   :  { %s1587_s28 = smov 128   ;;  %s1588_s29 = smov 8  }
  0x11   :  { %33 = dma.hbm_to_vmem [thread:$0]  %s1879_s0, 256, %s28_s19, [#allocation3], %s1587_s28, %s1587_s28, %s1588_s29  }
  0x12   :  { %1582 = dma.done.wait [#allocation3], 256  }
  0x13   :  { %1583 = vsyncadd [#allocation3], 4294967040  ;;  %vm78_vm0 = vcmask 261120   ;;  %v67_v0 = vld [vmem:[%s1882_s3] sm:$0xff]  ;;  %v68_v1 = vld [vmem:[%s1882_s3 + $0x8] sm:$0xff]  ;;  %v1589_v8 = vmov 0.0   ;;  %v482_v22 = vlaneseq }
  0x14   :  { %v69_v2 = vld [vmem:[%s1882_s3 + $0x10] sm:$0xff]  ;;  %v1459_v3 = vpack.c.bf16 %v68_v1, %v67_v0  ;;  %v70_v4 = vld [vmem:[%s1882_s3 + $0x18] sm:$0xff]  ;;  %v1701_v5 = vld [vmem:[#allocation2] sm:$0xff]  ;;  %1388 = vmatprep.subr.mxu0 %v1589_v8  ;;  %vm1590_vm1 = vmmov 0   ;;  %s1591_s19 = smov 96   ;;  %s1592_s26 = smov 112  }
  0x15   :  { %v1463_v6 = vpack.c.bf16 %v70_v4, %v69_v2  ;;  %1375 = vmatprep.mubr.msk.f32.mxu1 %vm78_vm0, %v1701_v5  ;;  %v1705_v7 = vld [vmem:[#allocation2 + $0x8] sm:$0xff]  ;;  %1390 = vmatprep.mubr.msk.f32.mxu0 %vm1590_vm1, %v1589_v8  ;;  %v1294_v9 = vld [vmem:[%s1883_s4] ss:$0 sm:$0xff]  ;;  %vm168_vm2 = vcmask 130048   ;;  %v1593_v20 = vmov 1966171168  }
  0x16   :  { %1460 = vmatprep.subr.bf16.mxu1 %v1459_v3  ;;  %v480_v21 = vunpack.c.l.s4 %v1593_v20  ;;  %v475_v23 = vld [vmem:[%s1880_s1] sm:$0x3]  ;;  %v483_v26 = vshrl.u32 %v482_v22, 7  ;;  %vm515_vm3 = vcmask 64512   ;;  %s1594_s1 = smov 64   ;;  %s1595_s22 = smov 16  }
  0x17   :  { %1462 = vmatpush3.bf16.msra.mxu1 %v1459_v3  ;;  %v1305_v24 = vadd.f32 -1.0, %v475_v23  ;;  %vm1138_vm4 = vcmask 523264   ;;  %vm1273_vm5 = vcmask 1041409   ;;  %s1596_s29 = smov [#allocation5]   ;;  %vm1277_vm7 = vcmask 254976  }
  0x18   :  { %1464 = vmatprep.subr.bf16.mxu1 %v1463_v6  ;;  %v481_v25 = vunpack.c.0.s8 %v480_v21  ;;  %v503_v31 = vsub.s32 0, %v483_v26 }
  0x19   :  { %v477_v27 = vmul.f32 1e+09, %v1305_v24 }
  0x1a   :  { %v484_v28 = vsub.s32 %v481_v25, %v483_v26 }
  0x1b   :  { %1466 = vmatpush3.bf16.msra.mxu1 %v1463_v6 }
  0x1c   :  { %1378 = vmatprep.subr.mxu1 %v1589_v8  ;;  %v485_v29 = vrot.slane %v477_v27, %v484_v28 }
  0x1e   :  { %1376 = vmatmul.mubr.msk.f32.vlgmr.msra.gmra.mrb[0].mxu1 %vm78_vm0, %v1705_v7  ;;  %v493_v30 = vrot.slane %v485_v29, %v484_v28  ;;  %v486_v32 = vcombine.high %v485_v29, %v485_v29 }
  0x1f   :  { %1380 = vmatprep.mubr.msk.f32.mxu1 %vm1590_vm1, %v1589_v8 }
  0x20   :  { %v504_v33 = vrot.slane %v493_v30, %v503_v31  ;;  %v500_v34 = vrot.slane %v486_v32, %v484_v28  ;;  %v875_v32 = vld [vmem:[%s1884_s5 + $0x8] sm:$0xff] }
  0x22   :  { %v508_v39 = vrot.slane %v500_v34, %v503_v31  ;;  %v874_v31 = vld [vmem:[%s1884_s5] sm:$0xff] }
  0xf1   :  { %v1377_v10 = vpop.f32.mrb[0].mxu1 }
  0xf2   :  { %v151_v11 = vpop.f32.mrb[1].mxu1  ;;  %v1718_v13 = vadd.f32 %v1377_v10, %v1294_v9 }
  0xf3   :  { %v152_v12 = vadd.f32 %v1294_v9, %v151_v11 }
  0xf5   :  { %166 = vrot.lane.b32.xlu1 %v152_v12, %s1591_s19  ;;  %162 = vrot.lane.b32.xlu0 %v152_v12, %s1592_s26 }
  0xf9   :  { %243 = vrot.lane.b32.xlu1 %v1718_v13, %s1591_s19  ;;  %164 = vrot.lane.b32.xlu0 %v1718_v13, %s1592_s26 }
 0x167   :  { %v167_v14 = vpop.permute.xlu1 %166  ;;  %v1722_v15 = vpop.permute.xlu0 %162 }
 0x168   :  { %1379 = vmatpush3.xpose.msk.msra.mxu1 %vm168_vm2, %v167_v14  ;;  %319 = vrot.lane.b32.xlu0 %v1722_v15, %s1591_s19 }
 0x169   :  { %1383 = vmatprep.subr.mxu1 %v1589_v8 }
 0x16b   :  { %1381 = vmatmul.mubr.msk.f32.vlgmr.msra.gmra.mrb[2].mxu1 %vm168_vm2, %v152_v12  ;;  %v244_v16 = vpop.permute.xlu1 %243  ;;  %v1728_v17 = vpop.permute.xlu0 %164 }
 0x16c   :  { %1384 = vmatpush3.xpose.msk.msra.mxu1 %vm168_vm2, %v244_v16  ;;  %395 = vrot.lane.b32.xlu1 %v1728_v17, %s1591_s19 }
 0x16d   :  { %1385 = vmatprep.mubr.msk.f32.mxu1 %vm1590_vm1, %v1589_v8  ;;  %1393 = vmatprep.subr.mxu1 %v1589_v8 }
 0x16f   :  { %1386 = vmatmul.mubr.msk.f32.vlgmr.msra.gmra.mrb[4].mxu1 %vm168_vm2, %v1718_v13 }
 0x170   :  { %1395 = vmatprep.mubr.msk.f32.mxu1 %vm1590_vm1, %v1589_v8 }
 0x1da   :  { %v320_v18 = vpop.permute.xlu0 %319 }
 0x1db   :  { %1389 = vmatpush3.xpose.msk.msra.mxu0 %vm168_vm2, %v320_v18 }
 0x1dc   :  { %1398 = vmatprep.subr.mxu0 %v1589_v8 }
 0x1de   :  { %v396_v19 = vpop.permute.xlu1 %395  ;;  %1391 = vmatmul.mubr.msk.f32.vlgmr.msra.gmra.mrb[0].mxu0 %vm168_vm2, %v1722_v15 }
 0x1df   :  { %1394 = vmatpush3.xpose.msk.msra.mxu1 %vm168_vm2, %v396_v19  ;;  %1400 = vmatprep.mubr.msk.f32.mxu0 %vm1590_vm1, %v1589_v8 }
 0x1e0   :  { %1403 = vmatprep.subr.mxu1 %v1589_v8 }
 0x1e2   :  { %1396 = vmatmul.mubr.msk.f32.vlgmr.msra.gmra.mrb[6].mxu1 %vm168_vm2, %v1728_v17 }
 0x1e3   :  { %1405 = vmatprep.mubr.msk.f32.mxu1 %vm1590_vm1, %v1589_v8 }
 0x23e   :  { %v239_v35 = vpop.f32.mrb[2].mxu1 }
 0x23f   :  { %v471_v36 = vmul.f32 0.25, %v239_v35  ;;  %v1382_v37 = vpop.f32.mrb[3].mxu1  ;;  %v876_v35 = vld [vmem:[%s1884_s5 + $0x10] sm:$0xff] }
 0x241   :  { %v511_v38 = vadd.f32 %v504_v33, %v471_v36  ;;  %v877_v36 = vld [vmem:[%s1884_s5 + $0x18] sm:$0xff] }
 0x242   :  { %v315_v40 = vpop.f32.mrb[4].mxu1  ;;  %v1471_v37 = vpack.c.bf16 %v877_v36, %v876_v35  ;;  %v1130_v35 = vld [vmem:[%s1890_s11 + $0x38] sm:$0xff] }
 0x243   :  { %v472_v41 = vmul.f32 0.25, %v315_v40  ;;  %v1387_v42 = vpop.f32.mrb[5].mxu1  ;;  %v516_v43 = vsel %vm515_vm3, %v511_v38, -inf }
 0x244   :  { %517 = vmax.xlane.f32.xlu0 %v516_v43 }
 0x245   :  { %v512_v44 = vadd.f32 %v508_v39, %v472_v41 }
 0x247   :  { %v519_v45 = vsel %vm515_vm3, %v512_v44, -inf }
 0x248   :  { %520 = vmax.xlane.f32.xlu1 %v519_v45 }
 0x259   :  { %560 = vrot.lane.b32.xlu1 %v152_v12, %s1594_s1 }
 0x2b1   :  { %v391_v46 = vpop.f32.mrb[0].mxu0 }
 0x2b2   :  { %v473_v47 = vmul.f32 0.25, %v391_v46  ;;  %v1392_v48 = vpop.f32.mrb[1].mxu0 }
 0x2b3   :  { %v1310_v48 = vld [vmem:[%s1885_s6] ss:$0 sm:$0xff] }
 0x2b4   :  { %v513_v49 = vadd.f32 %v504_v33, %v473_v47  ;;  %v1467_v33 = vpack.c.bf16 %v875_v32, %v874_v31  ;;  %v1127_v32 = vld [vmem:[%s1890_s11 + $0x20] sm:$0xff] }
 0x2b5   :  { %v467_v50 = vpop.f32.mrb[6].mxu1 }
 0x2b6   :  { %v474_v51 = vmul.f32 0.25, %v467_v50  ;;  %v1397_v52 = vpop.f32.mrb[7].mxu1  ;;  %v522_v53 = vsel %vm515_vm3, %v513_v49, -inf }
 0x2b7   :  { %523 = vmax.xlane.f32.xlu0 %v522_v53 }
 0x2b8   :  { %v514_v54 = vadd.f32 %v508_v39, %v474_v51 }
 0x2ba   :  { %v525_v55 = vsel %vm515_vm3, %v514_v54, -inf }
 0x2bb   :  { %526 = vmax.xlane.f32.xlu0 %v525_v55 }
 0x2d1   :  { %v518_v56 = vpop.xlane.xlu0 %517 }
 0x2d2   :  { %v528_v57 = vsub.f32 %v511_v38, %v518_v56 }
 0x2d4   :  { %v532_v58 = vmul.f32 1.442695, %v528_v57 }
 0x2d5   :  { %v521_v59 = vpop.xlane.xlu1 %520 }
 0x2d6   :  { %1510 = vpow2.f32 %v532_v58  ;;  %v529_v60 = vsub.f32 %v512_v44, %v521_v59 }
 0x2d8   :  { %v534_v61 = vmul.f32 1.442695, %v529_v60 }
 0x2d9   :  { %v561_v62 = vpop.permute.xlu1 %560 }
 0x2da   :  { %1512 = vpow2.f32 %v534_v61  ;;  %1399 = vmatpush3.msra.mxu0 %v561_v62 }
 0x2db   :  { %1408 = vmatprep.subr.mxu0 %v1589_v8 }
 0x2e0   :  { %v1511_v63 = vpop.eup %1510 }
 0x2e1   :  { %v540_v0 = vsel %vm515_vm3, %v1511_v63, 0.0 }
 0x2e2   :  { %541 = vadd.xlane.f32.xlu1 %v540_v0 }
 0x2e4   :  { %v1513_v1 = vpop.eup %1512 }
 0x2e5   :  { %v543_v2 = vsel %vm515_vm3, %v1513_v1, 0.0 }
 0x2e6   :  { %544 = vadd.xlane.f32.xlu0 %v543_v2  ;;  %v1014_v2 = vld [vmem:[%s1888_s9 + $0x8] sm:$0xff] }
 0x2f3   :  { %712 = vrot.lane.b32.xlu1 %v1722_v15, %s1594_s1 }
 0x344   :  { %v524_v3 = vpop.xlane.xlu0 %523 }
 0x345   :  { %v530_v4 = vsub.f32 %v513_v49, %v524_v3 }
 0x347   :  { %v536_v6 = vmul.f32 1.442695, %v530_v4  ;;  %v1015_v4 = vld [vmem:[%s1888_s9 + $0x10] sm:$0xff] }
 0x348   :  { %v527_v9 = vpop.xlane.xlu0 %526 }
 0x349   :  { %1514 = vpow2.f32 %v536_v6  ;;  %v531_v10 = vsub.f32 %v514_v54, %v527_v9  ;;  %v1016_v6 = vld [vmem:[%s1888_s9 + $0x18] sm:$0xff] }
 0x34a   :  { %v1479_v9 = vpack.c.bf16 %v1016_v6, %v1015_v4 }
 0x34b   :  { %v538_v11 = vmul.f32 1.442695, %v531_v10 }
 0x34d   :  { %1516 = vpow2.f32 %v538_v11 }
 0x353   :  { %v1515_v12 = vpop.eup %1514 }
 0x354   :  { %v546_v14 = vsel %vm515_vm3, %v1515_v12, 0.0 }
 0x355   :  { %547 = vadd.xlane.f32.xlu1 %v546_v14 }
 0x357   :  { %v1517_v16 = vpop.eup %1516 }
 0x358   :  { %v549_v18 = vsel %vm515_vm3, %v1517_v16, 0.0 }
 0x359   :  { %550 = vadd.xlane.f32.xlu0 %v549_v18 }
 0x366   :  { %788 = vrot.lane.b32.xlu1 %v1728_v17, %s1594_s1 }
 0x36f   :  { %v542_v15 = vpop.xlane.xlu1 %541  ;;  %636 = vrot.lane.b32.xlu0 %v1718_v13, %s1594_s1 }
 0x370   :  { %1518 = vrcp.f32 %v542_v15 }
 0x373   :  { %v713_v21 = vpop.permute.xlu1 %712  ;;  %v545_v22 = vpop.xlane.xlu0 %544 }
 0x374   :  { %1520 = vrcp.f32 %v545_v22 }
 0x37a   :  { %v1519_v19 = vpop.eup %1518 }
 0x37b   :  { %v553_v20 = vmul.f32 %v1519_v19, %v1511_v63  ;;  %v1313_v19 = vld [vmem:[%s1886_s7] ss:$0 sm:$0xff] }
 0x37d   :  { %1401 = vmatmul.mubr.msk.f32.vlgmr.msra.gmra.mrb[2].mxu0 %vm515_vm3, %v553_v20 }
 0x37e   :  { %1409 = vmatpush3.msra.mxu0 %v713_v21  ;;  %1410 = vmatprep.mubr.msk.f32.mxu0 %vm1590_vm1, %v1589_v8  ;;  %v1521_v17 = vpop.eup %1520  ;;  %v1314_v21 = vld [vmem:[%s1887_s8] ss:$0 sm:$0xff] }
 0x37f   :  { %v555_v25 = vmul.f32 %v1521_v17, %v1513_v1  ;;  %1468 = vmatprep.subr.bf16.mxu0 %v1467_v33 }
 0x3e2   :  { %v548_v23 = vpop.xlane.xlu1 %547 }
 0x3e3   :  { %1522 = vrcp.f32 %v548_v23 }
 0x3e6   :  { %v551_v24 = vpop.xlane.xlu0 %550  ;;  %v789_v13 = vpop.permute.xlu1 %788 }
 0x3e7   :  { %1524 = vrcp.f32 %v551_v24 }
 0x3ea   :  { %v637_v26 = vpop.permute.xlu0 %636 }
 0x3eb   :  { %1404 = vmatpush3.msra.mxu1 %v637_v26 }
 0x3ec   :  { %1406 = vmatmul.mubr.msk.f32.vlgmr.msra.gmra.mrb[8].mxu1 %vm515_vm3, %v555_v25  ;;  %1413 = vmatprep.subr.mxu1 %v1589_v8 }
 0x3ed   :  { %v1523_v27 = vpop.eup %1522  ;;  %1414 = vmatpush3.msra.mxu1 %v789_v13  ;;  %1415 = vmatprep.mubr.msk.f32.mxu1 %vm1590_vm1, %v1589_v8  ;;  %v1123_v13 = vld [vmem:[%s1890_s11] sm:$0xff] }
 0x3ee   :  { %v557_v28 = vmul.f32 %v1523_v27, %v1515_v12  ;;  %v1124_v27 = vld [vmem:[%s1890_s11 + $0x8] sm:$0xff] }
 0x3f0   :  { %1411 = vmatmul.mubr.msk.f32.vlgmr.msra.gmra.mrb[4].mxu0 %vm515_vm3, %v557_v28  ;;  %v1483_v28 = vpack.c.bf16 %v1124_v27, %v1123_v13  ;;  %v1322_v27 = vld [vmem:[%s1893_s14] ss:$0 sm:$0xff] }
 0x3f1   :  { %v1525_v29 = vpop.eup %1524  ;;  %1470 = vmatpush3.bf16.msra.mxu0 %v1467_v33  ;;  %v1128_v33 = vld [vmem:[%s1890_s11 + $0x28] sm:$0xff] }
 0x3f2   :  { %v559_v30 = vmul.f32 %v1525_v29, %v1517_v16  ;;  %1472 = vmatprep.subr.bf16.mxu0 %v1471_v37  ;;  %v1125_v29 = vld [vmem:[%s1890_s11 + $0x10] sm:$0xff] }
 0x3f4   :  { %1416 = vmatmul.mubr.msk.f32.vlgmr.msra.gmra.mrb[10].mxu1 %vm515_vm3, %v559_v30  ;;  %v1126_v30 = vld [vmem:[%s1890_s11 + $0x18] sm:$0xff] }
 0x3f5   :  { %1474 = vmatpush3.bf16.msra.mxu0 %v1471_v37  ;;  %v1487_v31 = vpack.c.bf16 %v1126_v30, %v1125_v29  ;;  %v1315_v37 = vld [vmem:[%s1889_s10] ss:$0 sm:$0xff] }
 0x3f6   :  { %1484 = vmatprep.subr.bf16.mxu0 %v1483_v28 }
 0x450   :  { %v632_v34 = vpop.f32.mrb[2].mxu0 }
 0x451   :  { %v1402_v8 = vpop.f32.mrb[3].mxu0 }
 0x452   :  { %v1129_v8 = vld [vmem:[%s1890_s11 + $0x30] sm:$0xff] }
 0x453   :  { %v1495_v36 = vpack.c.bf16 %v1130_v35, %v1129_v8 }
 0x4bf   :  { %v708_v38 = vpop.f32.mrb[8].mxu1 }
 0x4c0   :  { %v1407_v39 = vpop.f32.mrb[9].mxu1 }
 0x4c3   :  { %v784_v40 = vpop.f32.mrb[4].mxu0 }
 0x4c4   :  { %v1412_v41 = vpop.f32.mrb[5].mxu0  ;;  %866 = vrot.lane.b32.xlu0 %v784_v40, %s1595_s22 }
 0x4c7   :  { %v860_v42 = vpop.f32.mrb[10].mxu1 }
 0x4c8   :  { %868 = vrot.lane.b32.xlu1 %v860_v42, %s1595_s22  ;;  %v1417_v43 = vpop.f32.mrb[11].mxu1 }
 0x536   :  { %v867_v44 = vpop.permute.xlu0 %866 }
 0x537   :  { %v872_v45 = vsel %vm168_vm2, %v632_v34, %v867_v44  ;;  %v1491_v34 = vpack.c.bf16 %v1128_v33, %v1127_v32  ;;  %v1266_v32 = vld [vmem:[%s1881_s2] sm:$0x3] }
 0x538   :  { %1426 = vmatprep.mubr.msk.f32.mxu0 %vm78_vm0, %v872_v45  ;;  %vm1267_vm6 = vcmp.lt.u32.totalorder %v1266_v32, 3006477107 }
 0x53a   :  { %v869_v46 = vpop.permute.xlu1 %868 }
 0x53b   :  { %v873_v47 = vsel %vm168_vm2, %v708_v38, %v869_v46 }
 0x53c   :  { %1427 = vmatmul.mubr.msk.f32.vlgmr.msra.gmra.mrb[6].mxu0 %vm78_vm0, %v873_v47 }
 0x53d   :  { %1486 = vmatpush3.bf16.msra.mxu0 %v1483_v28 }
 0x53e   :  { %1488 = vmatprep.subr.bf16.mxu0 %v1487_v31 }
 0x541   :  { %1490 = vmatpush3.bf16.msra.mxu0 %v1487_v31 }
 0x542   :  { %1492 = vmatprep.subr.bf16.mxu0 %v1491_v34 }
 0x545   :  { %1494 = vmatpush3.bf16.msra.mxu0 %v1491_v34 }
 0x546   :  { %1496 = vmatprep.subr.bf16.mxu0 %v1495_v36 }
 0x549   :  { %1498 = vmatpush3.bf16.msra.mxu0 %v1495_v36 }
 0x60f   :  { %v1428_v49 = vpop.f32.mrb[6].mxu0 }
 0x610   :  { %v963_v50 = vadd.f32 %v1428_v49, %v1310_v48  ;;  %v957_v51 = vpop.f32.mrb[7].mxu0 }
 0x611   :  { %v958_v52 = vadd.f32 %v1310_v48, %v957_v51 }
 0x612   :  { %v967_v53 = vadd.f32 %v963_v50, %v1705_v7 }
 0x613   :  { %v966_v54 = vadd.f32 %v958_v52, %v1701_v5  ;;  %v1013_v5 = vld [vmem:[%s1888_s9] sm:$0xff] }
 0x614   :  { %v973_v55 = vsel %vm78_vm0, %v967_v53, 0.0  ;;  %v1475_v3 = vpack.c.bf16 %v1014_v2, %v1013_v5 }
 0x615   :  { %974 = vadd.xlane.f32.xlu1 %v973_v55  ;;  %v970_v56 = vsel %vm78_vm0, %v966_v54, 0.0 }
 0x616   :  { %971 = vadd.xlane.f32.xlu0 %v970_v56  ;;  %1476 = vmatprep.subr.bf16.mxu1 %v1475_v3 }
 0x617   :  { %1478 = vmatpush3.bf16.msra.mxu1 %v1475_v3 }
 0x618   :  { %1480 = vmatprep.subr.bf16.mxu1 %v1479_v9 }
 0x61b   :  { %1482 = vmatpush3.bf16.msra.mxu1 %v1479_v9 }
 0x6a2   :  { %v975_v57 = vpop.xlane.xlu1 %974 }
 0x6a3   :  { %v978_v58 = vmul.f32 0.03125, %v975_v57  ;;  %v972_v59 = vpop.xlane.xlu0 %971 }
 0x6a4   :  { %v977_v60 = vmul.f32 0.03125, %v972_v59 }
 0x6a5   :  { %v980_v61 = vsub.f32 %v967_v53, %v978_v58 }
 0x6a6   :  { %v979_v62 = vsub.f32 %v966_v54, %v977_v60  ;;  %v1318_v60 = vld [vmem:[%s1891_s12] ss:$0 sm:$0xff] }
 0x6a7   :  { %v982_v1 = vmul.f32 %v980_v61, %v980_v61 }
 0x6a8   :  { %v981_v63 = vmul.f32 %v979_v62, %v979_v62 }
 0x6a9   :  { %v986_v7 = vsel %vm78_vm0, %v982_v1, 0.0 }
 0x6aa   :  { %v983_v0 = vsel %vm78_vm0, %v981_v63, 0.0 }
 0x6ab   :  { %984 = vadd.xlane.f32.xlu0 %v983_v0 }
 0x6af   :  { %987 = vadd.xlane.f32.xlu0 %v986_v7 }
 0x738   :  { %v985_v10 = vpop.xlane.xlu0 %984 }
 0x739   :  { %v989_v11 = vmul.f32 0.03125, %v985_v10 }
 0x73b   :  { %v991_v12 = vadd.f32 1e-12, %v989_v11 }
 0x73c   :  { %v988_v14 = vpop.xlane.xlu0 %987 }
 0x73d   :  { %1526 = vrsqrt.f32 %v991_v12  ;;  %v990_v16 = vmul.f32 0.03125, %v988_v14 }
 0x73f   :  { %v992_v18 = vadd.f32 1e-12, %v990_v16 }
 0x741   :  { %1528 = vrsqrt.f32 %v992_v18 }
 0x747   :  { %v1527_v15 = vpop.eup %1526 }
 0x748   :  { %v995_v20 = vmul.f32 %v1527_v15, %v979_v62 }
 0x74a   :  { %v1003_v22 = vmul.f32 %v1313_v19, %v995_v20 }
 0x74b   :  { %v1529_v23 = vpop.eup %1528 }
 0x74c   :  { %v996_v24 = vmul.f32 %v1529_v23, %v980_v61  ;;  %v1011_v17 = vadd.f32 %v1314_v21, %v1003_v22 }
 0x74e   :  { %v1004_v25 = vmul.f32 %v1313_v19, %v996_v24  ;;  %1437 = vmatprep.mubr.msk.f32.mxu1 %vm78_vm0, %v1011_v17 }
 0x750   :  { %v1012_v26 = vadd.f32 %v1314_v21, %v1004_v25 }
 0x752   :  { %1438 = vmatmul.mubr.msk.f32.vlgmr.msra.gmra.mrb[12].mxu1 %vm78_vm0, %v1012_v26 }
 0x825   :  { %v1439_v38 = vpop.f32.mrb[12].mxu1 }
 0x826   :  { %v1102_v39 = vadd.f32 %v1439_v38, %v1315_v37  ;;  %v1096_v40 = vpop.f32.mrb[13].mxu1 }
 0x827   :  { %v1097_v41 = vadd.f32 %v1315_v37, %v1096_v40 }
 0x828   :  { %v1106_v42 = vmul.f32 %v1102_v39, %v1102_v39 }
 0x829   :  { %v1105_v43 = vmul.f32 %v1097_v41, %v1097_v41 }
 0x82a   :  { %v1108_v44 = vmul.f32 %v1106_v42, %v1102_v39 }
 0x82b   :  { %v1107_v45 = vmul.f32 %v1105_v43, %v1097_v41 }
 0x82c   :  { %v1110_v46 = vmul.f32 0.044715, %v1108_v44 }
 0x82d   :  { %v1109_v47 = vmul.f32 0.044715, %v1107_v45 }
 0x82e   :  { %v1112_v48 = vadd.f32 %v1110_v46, %v1102_v39 }
 0x82f   :  { %v1111_v49 = vadd.f32 %v1109_v47, %v1097_v41 }
 0x830   :  { %v1114_v50 = vmul.f32 0.7978846, %v1112_v48 }
 0x831   :  { %v1113_v51 = vmul.f32 0.7978846, %v1111_v49 }
 0x832   :  { %1530 = vtanh.f32 %v1114_v50 }
 0x833   :  { %1532 = vtanh.f32 %v1113_v51 }
 0x83c   :  { %v1531_v52 = vpop.eup %1530 }
 0x83d   :  { %v1533_v53 = vpop.eup %1532  ;;  %v1118_v54 = vadd.f32 1.0, %v1531_v52 }
 0x83e   :  { %v1117_v55 = vadd.f32 1.0, %v1533_v53 }
 0x83f   :  { %v1120_v56 = vmul.f32 0.5, %v1118_v54 }
 0x840   :  { %v1119_v57 = vmul.f32 0.5, %v1117_v55 }
 0x841   :  { %v1122_v59 = vmul.f32 %v1120_v56, %v1102_v39 }
 0x842   :  { %v1121_v58 = vmul.f32 %v1119_v57, %v1097_v41 }
 0x844   :  { %1456 = vmatprep.mubr.msk.f32.mxu0 %vm1138_vm4, %v1121_v58 }
 0x845   :  { %1457 = vmatmul.mubr.msk.f32.vlgmr.msra.gmra.mrb[8].mxu0 %vm1138_vm4, %v1122_v59 }
 0x918   :  { %v1458_v61 = vpop.f32.mrb[8].mxu0 }
 0x919   :  { %v1217_v62 = vadd.f32 %v1458_v61, %v1318_v60  ;;  %v1211_v63 = vpop.f32.mrb[9].mxu0 }
 0x91a   :  { %v1212_v0 = vadd.f32 %v1318_v60, %v1211_v63 }
 0x91b   :  { %v1221_v1 = vadd.f32 %v1217_v62, %v1012_v26 }
 0x91c   :  { %v1220_v7 = vadd.f32 %v1212_v0, %v1011_v17  ;;  %v1321_v17 = vld [vmem:[%s1892_s13] ss:$0 sm:$0xff]  ;;  %s1285_s13 = sshll.u32 %s1596_s29, 4  ;;  %s1286_s13 = int_to_ptr.vmem [resolvable:$true] %s1285_s13 }
 0x91d   :  { %v1227_v5 = vsel %vm78_vm0, %v1221_v1, 0.0  ;;  %s1560_s14 = scalar_lea.vmem %s1286_s13, 32  ;;  %p1565_p9 = scmp.lt.s32.totalorder %s1286_s13, %s1286_s13 }
 0x91e   :  { %1228 = vadd.xlane.f32.xlu1 %v1227_v5  ;;  %v1224_v2 = vsel %vm78_vm0, %v1220_v7, 0.0  ;;  %p1561_p8 = scmp.ne.s32.totalorder %s1286_s13, %s1560_s14  ;;  %p1566_p10 = scmp.lt.s32.totalorder %s1560_s14, %s1560_s14 }
 0x91f   :  { %1225 = vadd.xlane.f32.xlu0 %v1224_v2 }
 0x920   :  { %p1567_p11 = por %p1566_p10, %p1565_p9 }
 0x922   :  { %p1568_p12 = pnand %p1567_p11, %p1561_p8 }
 0x9ab   :  { %v1229_v3 = vpop.xlane.xlu1 %1228 }
 0x9ac   :  { %v1231_v4 = vmul.f32 0.03125, %v1229_v3  ;;  %v1226_v6 = vpop.xlane.xlu0 %1225 }
 0x9ad   :  { %v1230_v9 = vmul.f32 0.03125, %v1226_v6 }
 0x9ae   :  { %v1233_v10 = vsub.f32 %v1221_v1, %v1231_v4 }
 0x9af   :  { %v1232_v11 = vsub.f32 %v1220_v7, %v1230_v9 }
 0x9b0   :  { %v1235_v12 = vmul.f32 %v1233_v10, %v1233_v10 }
 0x9b1   :  { %v1234_v14 = vmul.f32 %v1232_v11, %v1232_v11 }
 0x9b2   :  { %v1239_v16 = vsel %vm78_vm0, %v1235_v12, 0.0 }
 0x9b3   :  { %1240 = vadd.xlane.f32.xlu1 %v1239_v16  ;;  %v1236_v18 = vsel %vm78_vm0, %v1234_v14, 0.0 }
 0x9b4   :  { %1237 = vadd.xlane.f32.xlu0 %v1236_v18 }
 0xa40   :  { %v1241_v15 = vpop.xlane.xlu1 %1240 }
 0xa41   :  { %v1243_v19 = vmul.f32 0.03125, %v1241_v15  ;;  %v1238_v20 = vpop.xlane.xlu0 %1237 }
 0xa42   :  { %v1242_v21 = vmul.f32 0.03125, %v1238_v20 }
 0xa43   :  { %v1245_v22 = vadd.f32 1e-12, %v1243_v19 }
 0xa44   :  { %v1244_v23 = vadd.f32 1e-12, %v1242_v21 }
 0xa45   :  { %1534 = vrsqrt.f32 %v1245_v22 }
 0xa46   :  { %1536 = vrsqrt.f32 %v1244_v23 }
 0xa4f   :  { %v1535_v24 = vpop.eup %1534 }
 0xa50   :  { %v1537_v25 = vpop.eup %1536  ;;  %v1249_v26 = vmul.f32 %v1535_v24, %v1233_v10 }
 0xa51   :  { %v1248_v13 = vmul.f32 %v1537_v25, %v1232_v11 }
 0xa52   :  { %v1257_v28 = vmul.f32 %v1321_v17, %v1249_v26 }
 0xa53   :  { %v1256_v29 = vmul.f32 %v1321_v17, %v1248_v13 }
 0xa54   :  { %v1265_v30 = vadd.f32 %v1322_v27, %v1257_v28 }
 0xa55   :  { %v1264_v31 = vadd.f32 %v1322_v27, %v1256_v29 }
 0xa56   :  { %v1269_v33 = vmul.f32 1.4285715, %v1265_v30 }
 0xa57   :  { %v1268_v34 = vmul.f32 1.4285715, %v1264_v31 }
 0xa58   :  { %v1272_v8 = vrot.slane %v1269_v33, 7 }
 0xa5a   :  { %v1274_v35 = vsel %vm1273_vm5, %v1272_v8, %v1268_v34 }
 0xa5b   :  { %v1276_v36 = vsel %vm1267_vm6, %v1274_v35, 0.0 }
 0xa5c   :  { %1278 = vst.msk [vmem:[#allocation5] sm:$0x3] %vm1277_vm7, %v1276_v36 }
 0xa5d   :  { %1571 = shalt.err (!%p1568_p12)
}
 0xa5e   :  { %s1572_s30 = scalar_lea.hbm %s1894_s15, 32 }
 0xa5f   :  { %p1573_p13 = scmp.ne.s32.totalorder %s1894_s15, %s1572_s30  ;;  %p1576_p0 = scmp.lt.u32.totalorder %s1572_s30, %s1894_s15 }
 0xa61   :  { %p1578_p1 = pnand %p1576_p0, %p1573_p13 }
 0xa63   :  { %1581 = shalt.err (!%p1578_p1)
}
 0xa64   :  { %1288 = dma.vmem_to_hbm [thread:$0]  %s1286_s13, 32, %s1894_s15, [#allocation4]  }
 0xa65   :  { %1584 = dma.done.wait [#allocation4], 32  }
 0xa66   :  { %1585 = vsyncadd [#allocation4], 4294967264 }
 0xa67   :  { %1292 = vsyncpa [#allocation3], 1 }
 0xa68   :  { %1293 = vsyncpa [#allocation4], 1 }

</bundles_post_ra>
